<compile_context>
chip_gen: v7x
topology: tpu7x:2x2x1
jax: 0.10.0
libtpu: 0.0.40
codegen_flags: <defaults>
</compile_context>

<pallas_src>
import functools

import jax
import jax.numpy as jnp
from jax.experimental import pallas as pl
from jax.experimental.pallas import tpu as pltpu


def _round_up(x, m):
    return ((x + m - 1) // m) * m


def _ls_ce_kernel(pred_ref, tgt_ref, out_ref, *, smoothing, num_classes):
    # pred_ref: (TN, C) float; tgt_ref: (TN, 1) int32; out_ref: (TN, 1) float32.
    # Compute in f32 regardless of the input dtype (bf16 inputs supported and
    # halve the HBM read).
    logits = pred_ref[...].astype(jnp.float32)                         # (TN, C)

    # Numerically-stable log_softmax pieces WITHOUT materializing log_probs:
    #   log_probs = shifted - lse, shifted = logits - max, lse = log(sum exp(shifted))
    m = jnp.max(logits, axis=-1, keepdims=True)                        # (TN, 1)
    shifted = logits - m                                               # (TN, C)
    lse = jnp.log(jnp.sum(jnp.exp(shifted), axis=-1, keepdims=True))   # (TN, 1)

    # Gather shifted[target] via iota + masked sum (no dynamic gather on TPU).
    # Precondition: targets must lie in [0, C); out-of-range targets silently
    # contribute 0 to the picked term (PyTorch would raise instead).
    cls_ids = jax.lax.broadcasted_iota(jnp.int32, shifted.shape, 1)    # (TN, C)
    tgt = tgt_ref[...]                                                 # (TN, 1)
    picked_shifted = jnp.sum(jnp.where(cls_ids == tgt, shifted, 0.0),
                             axis=-1, keepdims=True)                   # (TN, 1)
    mean_shifted = jnp.sum(shifted, axis=-1, keepdims=True) * (1.0 / num_classes)

    # loss = (1-s)*(lse - picked_shifted) + s*(lse - mean_shifted)
    out_ref[...] = (lse
                    - (1.0 - smoothing) * picked_shifted
                    - smoothing * mean_shifted)


def label_smoothing_cross_entropy(pred, target, smoothing=0.1, block_n=None,
                                  vmem_input_budget_bytes=12 * 1024 * 1024):
    """Per-sample label-smoothing cross entropy.

    pred:   (N, C) float array (f32 or bf16; bf16 halves the HBM read).
    target: (N,)   int array with values in [0, C).
    Returns (N,) float32 per-sample loss (no reduction), matching the PyTorch module.
    """
    N, C = pred.shape
    dtype_size = jnp.dtype(pred.dtype).itemsize

    # Pick a large row tile: the kernel is memory-bound, so size the tile so the
    # double-buffered `pred` input stays under a conservative VMEM budget that
    # also fits v7x's 64 MiB physical VMEM (not just v5e/v6e's 128 MiB).
    if block_n is None:
        max_rows = vmem_input_budget_bytes // (2 * C * dtype_size)
        block_n = int(min(1024, max(16, max_rows)))
    block_n = min(block_n, _round_up(N, 16))
    block_n = max(16, (block_n // 16) * 16)    # multiple of 16 (bf16 sublane tile)

    # Pad rows so N divides evenly into blocks; padded rows are discarded.
    n_pad = _round_up(N, block_n)
    if n_pad != N:
        pred = jnp.pad(pred, ((0, n_pad - N), (0, 0)))
        target = jnp.pad(target, (0, n_pad - N))
    tgt2d = target.astype(jnp.int32).reshape(n_pad, 1)

    kernel = functools.partial(_ls_ce_kernel, smoothing=float(smoothing),
                               num_classes=C)

    grid = (n_pad // block_n,)
    pred_bytes = n_pad * C * dtype_size
    cost = pl.CostEstimate(
        flops=6 * n_pad * C,                # max/sub/cmp/select/sum/fma (VPU side)
        transcendentals=n_pad * C,          # exp over the tile (+ one log per row)
        bytes_accessed=pred_bytes + 2 * n_pad * 4,
    )
    # Double-buffered pred tiles dominate VMEM; raise v5e's 16 MiB scoped default
    # but stay well under v7x's 64 MiB physical VMEM.
    vmem_limit = int(min(max(32 * 1024 * 1024, 4 * block_n * C * dtype_size),
                         60 * 1024 * 1024))

    out = pl.pallas_call(
        kernel,
        out_shape=jax.ShapeDtypeStruct((n_pad, 1), jnp.float32),
        grid_spec=pltpu.PrefetchScalarGridSpec(
            num_scalar_prefetch=0,
            grid=grid,
            in_specs=[
                pl.BlockSpec((block_n, C), lambda i: (i, 0)),
                pl.BlockSpec((block_n, 1), lambda i: (i, 0)),
            ],
            out_specs=pl.BlockSpec((block_n, 1), lambda i: (i, 0)),
        ),
        compiler_params=pltpu.CompilerParams(
            dimension_semantics=("parallel",),   # row grid shards across TCs (v7x)
            vmem_limit_bytes=vmem_limit,
        ),
        cost_estimate=cost,
    )(pred, tgt2d)
    return out.reshape(n_pad)[:N]


if __name__ == "__main__":
    key = jax.random.PRNGKey(0)
    k1, k2 = jax.random.split(key)

    # CIFAR-style small example: 20 logit rows over 10 classes (also exercises
    # the row-padding path, since 20 is not a multiple of the row tile).
    N, C = 20, 10
    pred = jax.random.normal(k1, (N, C), dtype=jnp.float32)
    target = jax.random.randint(k2, (N,), 0, C, dtype=jnp.int32)

    loss = jax.block_until_ready(
        label_smoothing_cross_entropy(pred, target, smoothing=0.1))

    # Reference check (plain JAX), same math as the PyTorch module.
    lp = jax.nn.log_softmax(pred.astype(jnp.float32), axis=-1)
    nll_ref = -jnp.take_along_axis(lp, target[:, None], axis=-1)[:, 0]
    smooth_ref = -jnp.mean(lp, axis=-1)
    ref = 0.9 * nll_ref + 0.1 * smooth_ref
    assert jnp.allclose(loss, ref, atol=1e-5, rtol=1e-5), (loss, ref)

    # bf16 input path (halves the HBM read when the producer is already bf16).
    pred_bf16 = pred.astype(jnp.bfloat16)
    loss_bf = jax.block_until_ready(
        label_smoothing_cross_entropy(pred_bf16, target, smoothing=0.1))
    lp_bf = jax.nn.log_softmax(pred_bf16.astype(jnp.float32), axis=-1)
    nll_bf = -jnp.take_along_axis(lp_bf, target[:, None], axis=-1)[:, 0]
    smooth_bf = -jnp.mean(lp_bf, axis=-1)
    ref_bf = 0.9 * nll_bf + 0.1 * smooth_bf
    assert jnp.allclose(loss_bf, ref_bf, atol=1e-4, rtol=1e-4), (loss_bf, ref_bf)

    print("KERNEL_OK")
</pallas_src>

<mosaic_0001>
module attributes {stable_mosaic.version = 11 : i64} {
  func.func @_ls_ce_kernel(%arg0: i32, %arg1: memref<32x10xf32, #tpu.memory_space<vmem>>, %arg2: memref<32x1xi32, #tpu.memory_space<vmem>>, %arg3: memref<32x1xf32, #tpu.memory_space<vmem>>) attributes {dimension_semantics = [#tpu.dimension_semantics<parallel>], iteration_bounds = array<i64: 1>, scalar_prefetch = 0 : i64, scratch_operands = 0 : i64, tpu.core_type = #tpu.core_type<tc>, window_params = [{transform_indices = @transform_0, window_bounds = array<i64: 32, 10>}, {transform_indices = @transform_1, window_bounds = array<i64: 32, 1>}, {transform_indices = @transform_2, window_bounds = array<i64: 32, 1>}]} {
    %c0 = arith.constant 0 : index
    %c0_0 = arith.constant 0 : index
    %0 = vector.load %arg1[%c0, %c0_0] : memref<32x10xf32, #tpu.memory_space<vmem>>, vector<32x10xf32>
    %cst = arith.constant dense<0xFF800000> : vector<32xf32>
    %1 = vector.multi_reduction <maximumf>, %0, %cst [1] : vector<32x10xf32> to vector<32xf32>
    %2 = vector.shape_cast %1 : vector<32xf32> to vector<32x1xf32>
    %3 = vector.broadcast %2 : vector<32x1xf32> to vector<32x10xf32>
    %4 = arith.subf %0, %3 : vector<32x10xf32>
    %5 = math.exp %4 : vector<32x10xf32>
    %cst_1 = arith.constant dense<0.000000e+00> : vector<32xf32>
    %6 = vector.multi_reduction <add>, %5, %cst_1 [1] : vector<32x10xf32> to vector<32xf32>
    %7 = vector.shape_cast %6 : vector<32xf32> to vector<32x1xf32>
    %8 = math.log %7 : vector<32x1xf32>
    %9 = tpu.iota {dimensions = array<i32: 1>} : vector<32x10xi32>
    %c0_2 = arith.constant 0 : index
    %c0_3 = arith.constant 0 : index
    %10 = vector.load %arg2[%c0_2, %c0_3] : memref<32x1xi32, #tpu.memory_space<vmem>>, vector<32x1xi32>
    %11 = vector.broadcast %10 : vector<32x1xi32> to vector<32x10xi32>
    %12 = arith.cmpi eq, %9, %11 : vector<32x10xi32>
    %cst_4 = arith.constant 0.000000e+00 : f32
    %13 = vector.broadcast %cst_4 : f32 to vector<32x10xf32>
    %14 = arith.select %12, %4, %13 : vector<32x10xi1>, vector<32x10xf32>
    %cst_5 = arith.constant dense<0.000000e+00> : vector<32xf32>
    %15 = vector.multi_reduction <add>, %14, %cst_5 [1] : vector<32x10xf32> to vector<32xf32>
    %16 = vector.shape_cast %15 : vector<32xf32> to vector<32x1xf32>
    %cst_6 = arith.constant dense<0.000000e+00> : vector<32xf32>
    %17 = vector.multi_reduction <add>, %4, %cst_6 [1] : vector<32x10xf32> to vector<32xf32>
    %18 = vector.shape_cast %17 : vector<32xf32> to vector<32x1xf32>
    %cst_7 = arith.constant 1.000000e-01 : f32
    %19 = vector.broadcast %cst_7 : f32 to vector<32x1xf32>
    %20 = arith.mulf %18, %19 : vector<32x1xf32>
    %cst_8 = arith.constant 0.899999976 : f32
    %21 = vector.broadcast %cst_8 : f32 to vector<32x1xf32>
    %22 = arith.mulf %21, %16 : vector<32x1xf32>
    %23 = arith.subf %8, %22 : vector<32x1xf32>
    %cst_9 = arith.constant 1.000000e-01 : f32
    %24 = vector.broadcast %cst_9 : f32 to vector<32x1xf32>
    %25 = arith.mulf %24, %20 : vector<32x1xf32>
    %26 = arith.subf %23, %25 : vector<32x1xf32>
    %c0_10 = arith.constant 0 : index
    %c0_11 = arith.constant 0 : index
    %27 = vector.load %arg3[%c0_10, %c0_11] : memref<32x1xf32, #tpu.memory_space<vmem>>, vector<32x1xf32>
    tpu.vector_store %arg3[%c0_10, %c0_11], %26 {strides = array<i32>} : memref<32x1xf32, #tpu.memory_space<vmem>>, vector<32x1xf32>,
    return
  }
  func.func @transform_0(%arg0: i32) -> (i32, i32) {
    %c0_i32 = arith.constant 0 : i32
    %c0_i32_0 = arith.constant 0 : i32
    return %arg0, %c0_i32 : i32, i32
  }
  func.func @transform_1(%arg0: i32) -> (i32, i32) {
    %c0_i32 = arith.constant 0 : i32
    %c0_i32_0 = arith.constant 0 : i32
    return %arg0, %c0_i32 : i32, i32
  }
  func.func @transform_2(%arg0: i32) -> (i32, i32) {
    %c0_i32 = arith.constant 0 : i32
    %c0_i32_0 = arith.constant 0 : i32
    return %arg0, %c0_i32 : i32, i32
  }
}

</mosaic_0001>

<bundles_post_ra>
// kernel: tpu_custom_call.1
= control target key start
LH: loop header
LB: loop body
LE: loop exit
PB: predicated region body
PF: predicated region fallthrough
CT: control target
= control target key end

     0   :  { %vm15_vm0 = vcmask 80896   ;;  %v158_v3 = vmov 0   ;;  %v60_v20 = vlaneseq  ;;  %vm130_vm5 = vcmask 7168   ;;  %s230_s0 = inlined_call_operand.vmem [shape: f32[32,10], index: 0, kind: input, shape index: {}]   ;;  %s231_s1 = inlined_call_operand.vmem [shape: s32[32,1], index: 1, kind: input, shape index: {}]   ;;  %s232_s2 = inlined_call_operand.vmem [shape: f32[32,1], index: 2, kind: output, shape index: {}]  }
   0x1   :  { %v13_v0 = vld [vmem:[%s230_s0 + $0x10] sm:$0xff]  ;;  %v11_v1 = vld [vmem:[%s230_s0] sm:$0xff]  ;;  %v14_v2 = vld [vmem:[%s230_s0 + $0x18] sm:$0xff]  ;;  %141 = vset.pattern.permute.xlu1 %v158_v3  ;;  %140 = vset.pattern.permute.xlu0 %v158_v3 }
   0x2   :  { %v22_v4 = vsel %vm15_vm0, %v13_v0, -inf  ;;  %v16_v5 = vsel %vm15_vm0, %v11_v1, -inf  ;;  %v12_v6 = vld [vmem:[%s230_s0 + $0x8] sm:$0xff]  ;;  %v25_v7 = vsel %vm15_vm0, %v14_v2, -inf  ;;  %v64_v10 = vld [vmem:[%s231_s1 + $0x10] sm:$0xff]  ;;  %v62_v11 = vld [vmem:[%s231_s1] sm:$0xff] }
   0x3   :  { %23 = vmax.xlane.f32.xlu1 %v22_v4  ;;  %17 = vmax.xlane.f32.xlu0 %v16_v5  ;;  %v19_v8 = vsel %vm15_vm0, %v12_v6, -inf  ;;  %v63_v9 = vld [vmem:[%s231_s1 + $0x8] sm:$0xff]  ;;  %v65_v12 = vld [vmem:[%s231_s1 + $0x18] sm:$0xff]  ;;  %v61_v23 = vand.u32 127, %v60_v20 }
   0x7   :  { %26 = vmax.xlane.f32.xlu1 %v25_v7  ;;  %20 = vmax.xlane.f32.xlu0 %v19_v8 }
  0x18   :  { %70 = vperm.xlu1 %141, %v63_v9  }
  0x1c   :  { %73 = vperm.xlu1 %141, %v64_v10  }
  0x1d   :  { %67 = vperm.xlu0 %140, %v62_v11  }
  0x20   :  { %76 = vperm.xlu1 %141, %v65_v12  }
  0x90   :  { %v24_v13 = vpop.xlane.xlu1 %23  ;;  %v18_v14 = vpop.xlane.xlu0 %17 }
  0x91   :  { %v28_v15 = vsub.f32 %v11_v1, %v18_v14  ;;  %v30_v21 = vsub.f32 %v13_v0, %v24_v13 }
  0x93   :  { %v32_v18 = vmul.f32 1.442695, %v28_v15  ;;  %v36_v24 = vmul.f32 1.442695, %v30_v21  ;;  %v98_v44 = vsel %vm15_vm0, %v28_v15, 0.0  ;;  %v104_v47 = vsel %vm15_vm0, %v30_v21, 0.0 }
  0x94   :  { %v27_v16 = vpop.xlane.xlu1 %26  ;;  %v21_v17 = vpop.xlane.xlu0 %20 }
  0x95   :  { %v29_v19 = vsub.f32 %v12_v6, %v21_v17  ;;  %142 = vpow2.f32 %v32_v18  ;;  %v31_v25 = vsub.f32 %v14_v2, %v27_v16 }
  0x97   :  { %v34_v22 = vmul.f32 1.442695, %v29_v19  ;;  %v38_v28 = vmul.f32 1.442695, %v31_v25  ;;  %v101_v49 = vsel %vm15_vm0, %v29_v19, 0.0  ;;  %v107_v50 = vsel %vm15_vm0, %v31_v25, 0.0 }
  0x98   :  { %v71_v26 = vpop.permute.xlu1 %70 }
  0x99   :  { %144 = vpow2.f32 %v34_v22  ;;  %vm79_vm1 = vcmp.eq.s32.totalorder %v61_v23, %v71_v26 }
  0x9a   :  { %146 = vpow2.f32 %v36_v24  ;;  %v83_v32 = vsel %vm79_vm1, %v29_v19, 0.0 }
  0x9b   :  { %148 = vpow2.f32 %v38_v28  ;;  %v89_v34 = vsel %vm15_vm0, %v83_v32, 0.0 }
  0x9c   :  { %v68_v27 = vpop.permute.xlu0 %67  ;;  %v74_v31 = vpop.permute.xlu1 %73 }
  0x9d   :  { %vm78_vm2 = vcmp.eq.s32.totalorder %v61_v23, %v68_v27  ;;  %vm80_vm3 = vcmp.eq.s32.totalorder %v61_v23, %v74_v31 }
  0x9e   :  { %v82_v29 = vsel %vm78_vm2, %v28_v15, 0.0  ;;  %v84_v37 = vsel %vm80_vm3, %v30_v21, 0.0 }
  0x9f   :  { %v86_v30 = vsel %vm15_vm0, %v82_v29, 0.0  ;;  %v143_v33 = vpop.eup %142  ;;  %v92_v40 = vsel %vm15_vm0, %v84_v37, 0.0 }
  0xa0   :  { %87 = vadd.xlane.f32.xlu1 %v86_v30  ;;  %v40_v38 = vsel %vm15_vm0, %v143_v33, 0.0  ;;  %v77_v41 = vpop.permute.xlu1 %76 }
  0xa1   :  { %vm81_vm4 = vcmp.eq.s32.totalorder %v61_v23, %v77_v41 }
  0xa2   :  { %v85_v46 = vsel %vm81_vm4, %v31_v25, 0.0 }
  0xa3   :  { %v145_v35 = vpop.eup %144  ;;  %v95_v48 = vsel %vm15_vm0, %v85_v46, 0.0 }
  0xa4   :  { %90 = vadd.xlane.f32.xlu1 %v89_v34  ;;  %v43_v36 = vsel %vm15_vm0, %v145_v35, 0.0  ;;  %v147_v39 = vpop.eup %146 }
  0xa5   :  { %44 = vadd.xlane.f32.xlu0 %v43_v36  ;;  %v46_v42 = vsel %vm15_vm0, %v147_v39, 0.0  ;;  %v149_v43 = vpop.eup %148 }
  0xa6   :  { %v49_v45 = vsel %vm15_vm0, %v149_v43, 0.0 }
  0xa8   :  { %41 = vadd.xlane.f32.xlu1 %v40_v38 }
  0xa9   :  { %93 = vadd.xlane.f32.xlu0 %v92_v40 }
  0xac   :  { %47 = vadd.xlane.f32.xlu1 %v46_v42 }
  0xad   :  { %99 = vadd.xlane.f32.xlu0 %v98_v44 }
  0xb0   :  { %50 = vadd.xlane.f32.xlu1 %v49_v45 }
  0xb1   :  { %105 = vadd.xlane.f32.xlu0 %v104_v47 }
  0xb4   :  { %96 = vadd.xlane.f32.xlu1 %v95_v48 }
  0xb8   :  { %102 = vadd.xlane.f32.xlu1 %v101_v49 }
  0xbc   :  { %108 = vadd.xlane.f32.xlu1 %v107_v50 }
 0x12d   :  { %v88_v51 = vpop.xlane.xlu1 %87 }
 0x12e   :  { %v114_v63 = vmul.f32 0.9, %v88_v51 }
 0x131   :  { %v91_v52 = vpop.xlane.xlu1 %90 }
 0x132   :  { %v45_v53 = vpop.xlane.xlu0 %44  ;;  %v115_v11 = vmul.f32 0.9, %v91_v52 }
 0x135   :  { %v42_v54 = vpop.xlane.xlu1 %41 }
 0x136   :  { %150 = vlog2.f32 %v42_v54  ;;  %v94_v55 = vpop.xlane.xlu0 %93 }
 0x137   :  { %152 = vlog2.f32 %v45_v53  ;;  %v116_v7 = vmul.f32 0.9, %v94_v55 }
 0x139   :  { %v48_v56 = vpop.xlane.xlu1 %47 }
 0x13a   :  { %154 = vlog2.f32 %v48_v56  ;;  %v100_v57 = vpop.xlane.xlu0 %99 }
 0x13b   :  { %v110_v59 = vmul.f32 0.1, %v100_v57 }
 0x13d   :  { %v51_v58 = vpop.xlane.xlu1 %50  ;;  %v122_v3 = vmul.f32 0.1, %v110_v59 }
 0x13e   :  { %156 = vlog2.f32 %v51_v58  ;;  %v106_v61 = vpop.xlane.xlu0 %105 }
 0x13f   :  { %v112_v4 = vmul.f32 0.1, %v106_v61 }
 0x140   :  { %v151_v60 = vpop.eup %150 }
 0x141   :  { %v153_v62 = vpop.eup %152  ;;  %v53_v0 = vmul.f32 0.6931472, %v151_v60  ;;  %v97_v1 = vpop.xlane.xlu1 %96  ;;  %v124_v14 = vmul.f32 0.1, %v112_v4 }
 0x142   :  { %v55_v6 = vmul.f32 0.6931472, %v153_v62  ;;  %v117_v20 = vmul.f32 0.9, %v97_v1 }
 0x143   :  { %v118_v2 = vsub.f32 %v53_v0, %v114_v63 }
 0x144   :  { %v155_v5 = vpop.eup %154  ;;  %v119_v16 = vsub.f32 %v55_v6, %v115_v11 }
 0x145   :  { %v57_v8 = vmul.f32 0.6931472, %v155_v5  ;;  %v126_v9 = vsub.f32 %v118_v2, %v122_v3  ;;  %v103_v10 = vpop.xlane.xlu1 %102 }
 0x146   :  { %v111_v12 = vmul.f32 0.1, %v103_v10 }
 0x147   :  { %131 = vst.msk [vmem:[%s232_s2] sm:$0xff] %vm130_vm5, %v126_v9  ;;  %v120_v13 = vsub.f32 %v57_v8, %v116_v7 }
 0x148   :  { %v157_v15 = vpop.eup %156  ;;  %v123_v17 = vmul.f32 0.1, %v111_v12 }
 0x149   :  { %v59_v18 = vmul.f32 0.6931472, %v157_v15  ;;  %v128_v19 = vsub.f32 %v120_v13, %v124_v14  ;;  %v109_v21 = vpop.xlane.xlu1 %108 }
 0x14a   :  { %v127_v22 = vsub.f32 %v119_v16, %v123_v17  ;;  %v113_v23 = vmul.f32 0.1, %v109_v21 }
 0x14b   :  { %133 = vst.msk [vmem:[%s232_s2 + $0x10] sm:$0xff] %vm130_vm5, %v128_v19  ;;  %v121_v24 = vsub.f32 %v59_v18, %v117_v20 }
 0x14c   :  { %132 = vst.msk [vmem:[%s232_s2 + $0x8] sm:$0xff] %vm130_vm5, %v127_v22  ;;  %v125_v25 = vmul.f32 0.1, %v113_v23 }
 0x14e   :  { %v129_v26 = vsub.f32 %v121_v24, %v125_v25 }
 0x150   :  { %134 = vst.msk [vmem:[%s232_s2 + $0x18] sm:$0xff] %vm130_vm5, %v129_v26 }

</bundles_post_ra>
